<compile_context>
chip_gen: v6e
topology: v6e:2x2x1
jax: 0.10.0
libtpu: 0.0.40
codegen_flags: <defaults>
</compile_context>

<pallas_src>
import functools

import jax
import jax.numpy as jnp
import numpy as np
from jax.experimental import pallas as pl
from jax.experimental.pallas import tpu as pltpu

BN_EPS = 1e-5


def _pick_tile_rows(H, W, C_in, C2, C_out):
    """Row-tile so each grid step streams ~2K lanes but stays << 32 MiB VMEM."""
    wp2 = W + 2
    r = min(H, max(1, -(-2048 // wp2)))          # target ~2048 output lanes/step

    def footprint(rows):
        lout = rows * wp2
        ls = (rows + 2) * wp2 + 2
        b = 2 * C_in * ls * 2                    # double-buffered bf16 input strip
        b += 2 * 4 * C_out * lout * 2            # double-buffered bf16 output
        b += 3 * 4 * C2 * lout * 4               # f32 y / GLU temporaries
        b += 9 * (4 * C2 + 8 * C_out) * C_in * 2  # lifted weights (bf16)
        return b

    while r > 1 and footprint(r) > 8 * 1024 * 1024:
        r -= 1
    return r


def _conv_gemm(x_ref, w_ref, tile_rows, width):
    """In-VMEM im2col-free conv GEMM.

    x_ref: (1, C_in, Ls) bf16 -- one halo'd row strip, flattened to 1-D lanes
           in W+2-padded geometry (Ls = (tile_rows+2)*(W+2) + 2).
    w_ref: (9, rows, C_in) bf16 -- per-tap weights, tap = 3*sy + sx.
    Returns (rows, tile_rows*(W+2)) f32.  Each tap's contribution is a GEMM
    against a statically lane-offset window of the strip (offset = sy*(W+2)+sx),
    so the 9x read amplification stays in VMEM, never in HBM.
    """
    wp2 = width + 2
    lout = tile_rows * wp2
    acc = None
    for sy in range(3):
        for sx in range(3):
            s = sy * 3 + sx
            off = sy * wp2 + sx
            xv = x_ref[0, :, off:off + lout]                    # (C_in, lout) bf16
            t = jnp.dot(w_ref[s], xv, preferred_element_type=jnp.float32)
            acc = t if acc is None else acc + t
    return acc


# ---------------------------------------------------------------------------
# Pass 1: per-(phase, BN-channel) masked sum and *centered* sum-of-squares.
# ---------------------------------------------------------------------------
def _stats_kernel(x_ref, w_ref, c_ref, m_ref, sum_ref, cs_ref, *,
                  tile_rows, width):
    # x_ref: (1, C_in, Ls) bf16        halo'd strip
    # w_ref: (9, 4*C2, C_in) bf16      lifted per-phase conv weights (all taps)
    # c_ref: (4*C2, 1) f32             per-row variance shift (~= E[y])
    # m_ref: (1, 1, Lout) f32          validity mask (ghost cols/rows/strips = 0)
    # sum_ref / cs_ref: (1, 4*C2, 1) f32 per-core partial accumulators
    @pl.when(pl.program_id(1) == 0)
    def _init():
        sum_ref[...] = jnp.zeros_like(sum_ref)
        cs_ref[...] = jnp.zeros_like(cs_ref)

    y = _conv_gemm(x_ref, w_ref, tile_rows, width)              # (4*C2, Lout) f32
    m = m_ref[0]                                                # (1, Lout)
    yc = y - c_ref[...]
    sum_ref[...] += jnp.sum(y * m, axis=1, keepdims=True)[None]
    cs_ref[...] += jnp.sum(yc * yc * m, axis=1, keepdims=True)[None]


# ---------------------------------------------------------------------------
# Pass 2: conv GEMM + fused BN scale/shift + GLU, bf16 output.
# ---------------------------------------------------------------------------
def _apply_kernel(x_ref, wa_ref, wg_ref, sa_ref, ba_ref, sg_ref, bg_ref,
                  out_ref, *, tile_rows, width):
    a = _conv_gemm(x_ref, wa_ref, tile_rows, width)             # (4*C_out, Lout) f32
    g = _conv_gemm(x_ref, wg_ref, tile_rows, width)
    a = a * sa_ref[...] + ba_ref[...]
    g = g * sg_ref[...] + bg_ref[...]
    out_ref[...] = (a * jax.nn.sigmoid(g)).astype(out_ref.dtype)[None]


# ---------------------------------------------------------------------------
# Wrapper
# ---------------------------------------------------------------------------
def upsample_forward(x_nchw, weight, bias, gamma, beta, scale_factor=2,
                     tile_rows=None):
    """x_nchw: (N, C_in, H, W); weight: (2*chan_out, C_in, 3, 3).

    `bias` is accepted for API parity but unused: a conv bias added before a
    training-mode BatchNorm cancels exactly in (y - mean).
    """
    del bias
    assert scale_factor == 2, "kernel implements the nearest-2x sub-pixel form"
    f32, bf16 = jnp.float32, jnp.bfloat16
    N, C_in, H, W = x_nchw.shape
    C2 = weight.shape[0]            # 2 * chan_out (BN channels)
    C_out = C2 // 2
    K = 9 * C_in
    Wp2 = W + 2

    if tile_rows is None:
        tile_rows = _pick_tile_rows(H, W, C_in, C2, C_out)
    R = int(min(tile_rows, H))      # output rows per grid step
    T = -(-H // R)                  # strips per image
    Lout = R * Wp2                  # GEMM / output lanes per grid step
    Ls = (R + 2) * Wp2 + 2          # strip lanes (2-row halo + 2-lane tail pad)
    G = N * T                       # total strips
    Gh = -(-G // 2)                 # strips per core for the stats pass
    G_pad = 2 * Gh

    # ---- sub-pixel lifted weights: for output phase (pi, pj) the 3x3 conv on
    # the upsampled image collapses onto the 3x3 shift grid at orig resolution.
    L = jnp.array([[[1., 0., 0.], [0., 1., 1.], [0., 0., 0.]],
                   [[0., 0., 0.], [1., 1., 0.], [0., 0., 1.]]],
                  dtype=f32)                                   # (phase, shift, tap)
    w = weight.astype(f32)                                     # (C2, C_in, 3, 3)
    w_lift = jnp.einsum('ask,btl,ockl->abocst', L, L, w)       # (2,2,C2,C_in,3,3)
    # rows = (pi, pj, o), cols = (sy, sx, c_in)
    w_all = jnp.transpose(w_lift, (0, 1, 2, 4, 5, 3)).reshape(4 * C2, K)
    w_a = w_all.reshape(4, C2, K)[:, :C_out, :].reshape(4 * C_out, K)
    w_g = w_all.reshape(4, C2, K)[:, C_out:, :].reshape(4 * C_out, K)

    def to_taps(wm):                # (rows, 9*C_in) -> (9, rows, C_in) bf16
        rows = wm.shape[0]
        return jnp.transpose(wm.reshape(rows, 9, C_in), (1, 0, 2)).astype(bf16)

    w_all_t, w_a_t, w_g_t = to_taps(w_all), to_taps(w_a), to_taps(w_g)

    # ---- halo'd, W-padded row strips of x in bf16 (the only activation stream
    # the kernels read; no 9x im2col is ever materialized in HBM).
    xb = x_nchw.astype(bf16)
    xp = jnp.pad(xb, ((0, 0), (0, 0), (1, 1 + T * R - H), (1, 1)))
    ridx = jnp.arange(T)[:, None] * R + jnp.arange(R + 2)[None, :]   # (T, R+2)
    strips = xp[:, :, ridx, :]                                       # (N,C_in,T,R+2,Wp2)
    strips = jnp.transpose(strips, (0, 2, 1, 3, 4)).reshape(G, C_in, (R + 2) * Wp2)
    strips = jnp.pad(strips, ((0, G_pad - G), (0, 0), (0, 2)))       # (G_pad,C_in,Ls)

    # ---- per-strip validity mask: ghost cols (w >= W), ghost rows (>= H in the
    # last strip) and dummy strips contribute garbage y, so they are zeroed out
    # of the BN statistics (pass 2 just drops them in the final reshape).
    lane = np.arange(Lout)
    col_ok = (lane % Wp2) < W
    row_of = lane // Wp2
    t_of_g = np.arange(G) % T
    valid = col_ok[None, :] & ((t_of_g[:, None] * R + row_of[None, :]) < H)
    mask_np = np.zeros((G_pad, 1, Lout), np.float32)
    mask_np[:G, 0, :] = valid.astype(np.float32)
    mask = jnp.asarray(mask_np)

    # ---- per-(phase, channel) variance shift (~= E[y]); pass 1 accumulates
    # sum((y - c)^2) so the variance never suffers E[y^2]-E[y]^2 cancellation.
    mean_x = jnp.mean(x_nchw.astype(f32), axis=(0, 2, 3))            # (C_in,)
    c_shift = (w_all @ jnp.tile(mean_x, 9)).reshape(4 * C2, 1)

    # 32 MiB works on every generation: v5e scoped default is only 16 MiB and
    # v7x physical VMEM is 64 MiB; _pick_tile_rows keeps blocks << this budget.
    vmem_limit = 32 * 1024 * 1024

    # ---- pass 1: masked, centered per-(phase, channel) statistics.  Leading
    # size-2 "parallel" axis = one partial-accumulator slab per TensorCore.
    stats = functools.partial(_stats_kernel, tile_rows=R, width=W)
    ch_sum, ch_cs = pl.pallas_call(
        stats,
        out_shape=(jax.ShapeDtypeStruct((2, 4 * C2, 1), f32),
                   jax.ShapeDtypeStruct((2, 4 * C2, 1), f32)),
        grid_spec=pltpu.PrefetchScalarGridSpec(
            num_scalar_prefetch=0,
            grid=(2, Gh),
            in_specs=[
                pl.BlockSpec((1, C_in, Ls), lambda c, i: (c * Gh + i, 0, 0)),
                pl.BlockSpec((9, 4 * C2, C_in), lambda c, i: (0, 0, 0)),
                pl.BlockSpec((4 * C2, 1), lambda c, i: (0, 0)),
                pl.BlockSpec((1, 1, Lout), lambda c, i: (c * Gh + i, 0, 0)),
            ],
            out_specs=[
                pl.BlockSpec((1, 4 * C2, 1), lambda c, i: (c, 0, 0)),
                pl.BlockSpec((1, 4 * C2, 1), lambda c, i: (c, 0, 0)),
            ]),
        compiler_params=pltpu.CompilerParams(
            dimension_semantics=("parallel", "arbitrary"),
            vmem_limit_bytes=vmem_limit),
    )(strips, w_all_t, c_shift, mask)

    # ---- tiny BN statistics / folding (a handful of scalars; wrapper glue).
    S = jnp.sum(ch_sum, axis=0).reshape(4, C2)       # per-phase sums
    CS = jnp.sum(ch_cs, axis=0).reshape(4, C2)       # per-phase centered sumsq
    c_pc = c_shift.reshape(4, C2)
    n_p = jnp.asarray(N * H * W, f32)                # valid positions per phase
    cnt = 4.0 * n_p                                  # = N * (2H) * (2W)
    mean = jnp.sum(S, axis=0) / cnt
    d = c_pc - mean[None, :]
    var = jnp.sum(CS + 2.0 * d * (S - n_p * c_pc) + n_p * d * d, axis=0) / cnt
    inv = jax.lax.rsqrt(var + BN_EPS)
    scale = gamma.astype(f32) * inv
    shift = beta.astype(f32) - mean * scale
    scale_a = jnp.tile(scale[:C_out], 4).reshape(4 * C_out, 1)
    shift_a = jnp.tile(shift[:C_out], 4).reshape(4 * C_out, 1)
    scale_g = jnp.tile(scale[C_out:], 4).reshape(4 * C_out, 1)
    shift_g = jnp.tile(shift[C_out:], 4).reshape(4 * C_out, 1)

    # ---- pass 2: GEMM + fused BN + GLU, bf16 output (f32 math in-register).
    apply_fn = functools.partial(_apply_kernel, tile_rows=R, width=W)
    out_g = pl.pallas_call(
        apply_fn,
        out_shape=jax.ShapeDtypeStruct((G, 4 * C_out, Lout), bf16),
        grid_spec=pltpu.PrefetchScalarGridSpec(
            num_scalar_prefetch=0,
            grid=(G,),
            in_specs=[
                pl.BlockSpec((1, C_in, Ls), lambda g: (g, 0, 0)),
                pl.BlockSpec((9, 4 * C_out, C_in), lambda g: (0, 0, 0)),
                pl.BlockSpec((9, 4 * C_out, C_in), lambda g: (0, 0, 0)),
                pl.BlockSpec((4 * C_out, 1), lambda g: (0, 0)),
                pl.BlockSpec((4 * C_out, 1), lambda g: (0, 0)),
                pl.BlockSpec((4 * C_out, 1), lambda g: (0, 0)),
                pl.BlockSpec((4 * C_out, 1), lambda g: (0, 0)),
            ],
            out_specs=pl.BlockSpec((1, 4 * C_out, Lout), lambda g: (g, 0, 0))),
        compiler_params=pltpu.CompilerParams(
            dimension_semantics=("parallel",),
            vmem_limit_bytes=vmem_limit),
    )(strips, w_a_t, w_g_t, scale_a, shift_a, scale_g, shift_g)

    # ---- drop ghost cols/rows and un-interleave the 4 sub-pixel phases back
    # to NCHW (XLA glue; reads bf16, writes the final f32 output).
    out = out_g.reshape(N, T, 2, 2, C_out, R, Wp2)[..., :W]
    out = jnp.transpose(out, (0, 4, 1, 5, 2, 6, 3))        # (N,C,T,R,pi,W,pj)
    out = out.reshape(N, C_out, T * R, 2, W, 2)[:, :, :H]
    out = out.reshape(N, C_out, 2 * H, 2 * W)
    return out.astype(f32)


def reference_forward(x, weight, bias, gamma, beta, scale_factor=2):
    """Pure-JAX reference (matches PyTorch training-mode forward)."""
    x_up = jnp.repeat(jnp.repeat(x, scale_factor, axis=2), scale_factor, axis=3)
    y = jax.lax.conv_general_dilated(
        x_up, weight, window_strides=(1, 1), padding=((1, 1), (1, 1)),
        dimension_numbers=("NCHW", "OIHW", "NCHW"))
    y = y + bias[None, :, None, None]
    mean = jnp.mean(y, axis=(0, 2, 3), keepdims=True)
    var = jnp.mean((y - mean) ** 2, axis=(0, 2, 3), keepdims=True)
    y = (y - mean) * jax.lax.rsqrt(var + BN_EPS)
    y = y * gamma[None, :, None, None] + beta[None, :, None, None]
    c = y.shape[1] // 2
    return y[:, :c] * jax.nn.sigmoid(y[:, c:])


if __name__ == "__main__":
    key = jax.random.PRNGKey(0)
    k_x, k_w, k_b, k_g, k_be = jax.random.split(key, 5)

    # small shapes: batch=2, chan_in=4, chan_out=4, spatial=16
    N, C_in, H, W = 2, 4, 16, 16
    chan_out = 4
    C2 = chan_out * 2

    x = jax.random.normal(k_x, (N, C_in, H, W), dtype=jnp.float32)
    weight = 0.1 * jax.random.normal(k_w, (C2, C_in, 3, 3), dtype=jnp.float32)
    bias = 0.1 * jax.random.normal(k_b, (C2,), dtype=jnp.float32)
    gamma = 1.0 + 0.1 * jax.random.normal(k_g, (C2,), dtype=jnp.float32)
    beta = 0.1 * jax.random.normal(k_be, (C2,), dtype=jnp.float32)

    out = upsample_forward(x, weight, bias, gamma, beta)
    out = jax.block_until_ready(out)

    ref = reference_forward(x, weight, bias, gamma, beta)
    assert out.shape == (N, chan_out, 2 * H, 2 * W), out.shape
    max_err = float(jnp.max(jnp.abs(out - ref)))
    assert jnp.allclose(out, ref, atol=3e-2, rtol=3e-2), max_err

    print("KERNEL_OK")
</pallas_src>

<mosaic_0001>
module attributes {stable_mosaic.version = 11 : i64} {
  func.func @_stats_kernel(%arg0: i32, %arg1: i32, %arg2: memref<1x4x326xbf16, #tpu.memory_space<vmem>>, %arg3: memref<9x32x4xbf16, #tpu.memory_space<vmem>>, %arg4: memref<32x1xf32, #tpu.memory_space<vmem>>, %arg5: memref<1x1x288xf32, #tpu.memory_space<vmem>>, %arg6: memref<1x32x1xf32, #tpu.memory_space<vmem>>, %arg7: memref<1x32x1xf32, #tpu.memory_space<vmem>>) attributes {dimension_semantics = [#tpu.dimension_semantics<parallel>, #tpu.dimension_semantics<arbitrary>], iteration_bounds = array<i64: 2, 1>, scalar_prefetch = 0 : i64, scratch_operands = 0 : i64, tpu.core_type = #tpu.core_type<tc>, window_params = [{transform_indices = @transform_0, window_bounds = array<i64: 1, 4, 326>}, {pipeline_mode = #tpu.pipeline_mode<synchronous>, transform_indices = @transform_1, window_bounds = array<i64: 9, 32, 4>}, {pipeline_mode = #tpu.pipeline_mode<synchronous>, transform_indices = @transform_2, window_bounds = array<i64: 32, 1>}, {transform_indices = @transform_3, window_bounds = array<i64: 1, 1, 288>}, {transform_indices = @transform_4, window_bounds = array<i64: 1, 32, 1>}, {transform_indices = @transform_5, window_bounds = array<i64: 1, 32, 1>}]} {
    %c0_i32 = arith.constant 0 : i32
    %0 = arith.cmpi eq, %arg1, %c0_i32 : i32
    %1 = arith.extui %0 : i1 to i32
    %c0_i32_0 = arith.constant 0 : i32
    %2 = arith.cmpi ne, %1, %c0_i32_0 : i32
    scf.if %2 {
      %cst_67 = arith.constant 0.000000e+00 : f32
      %78 = vector.broadcast %cst_67 : f32 to vector<1x32x1xf32>
      %c0_68 = arith.constant 0 : index
      %c0_69 = arith.constant 0 : index
      %c0_70 = arith.constant 0 : index
      %79 = vector.load %arg6[%c0_68, %c0_69, %c0_70] : memref<1x32x1xf32, #tpu.memory_space<vmem>>, vector<1x32x1xf32>
      tpu.vector_store %arg6[%c0_68, %c0_69, %c0_70], %78 {strides = array<i32>} : memref<1x32x1xf32, #tpu.memory_space<vmem>>, vector<1x32x1xf32>,
      %cst_71 = arith.constant 0.000000e+00 : f32
      %80 = vector.broadcast %cst_71 : f32 to vector<1x32x1xf32>
      %c0_72 = arith.constant 0 : index
      %c0_73 = arith.constant 0 : index
      %c0_74 = arith.constant 0 : index
      %81 = vector.load %arg7[%c0_72, %c0_73, %c0_74] : memref<1x32x1xf32, #tpu.memory_space<vmem>>, vector<1x32x1xf32>
      tpu.vector_store %arg7[%c0_72, %c0_73, %c0_74], %80 {strides = array<i32>} : memref<1x32x1xf32, #tpu.memory_space<vmem>>, vector<1x32x1xf32>,
    } else {
    }
    %c0 = arith.constant 0 : index
    %c0_1 = arith.constant 0 : index
    %c0_2 = arith.constant 0 : index
    %3 = vector.load %arg2[%c0, %c0_1, %c0_2] : memref<1x4x326xbf16, #tpu.memory_space<vmem>>, vector<1x4x288xbf16>
    %4 = vector.shape_cast %3 : vector<1x4x288xbf16> to vector<4x288xbf16>
    %c0_3 = arith.constant 0 : index
    %c0_4 = arith.constant 0 : index
    %c0_5 = arith.constant 0 : index
    %5 = vector.load %arg3[%c0_3, %c0_4, %c0_5] : memref<9x32x4xbf16, #tpu.memory_space<vmem>>, vector<1x32x4xbf16>
    %6 = vector.shape_cast %5 : vector<1x32x4xbf16> to vector<32x4xbf16>
    %cst = arith.constant dense<0.000000e+00> : vector<32x288xf32>
    %7 = tpu.matmul %6, %4, %cst {dimension_numbers = #tpu.dot_dimension_numbers<[1], [0], [0], [1], [0, 0, 1, 1], [], []>} : vector<32x4xbf16>, vector<4x288xbf16>, vector<32x288xf32> -> vector<32x288xf32>
    %c0_6 = arith.constant 0 : index
    %c0_7 = arith.constant 0 : index
    %c1 = arith.constant 1 : index
    %8 = vector.load %arg2[%c0_6, %c0_7, %c1] : memref<1x4x326xbf16, #tpu.memory_space<vmem>>, vector<1x4x288xbf16>
    %9 = vector.shape_cast %8 : vector<1x4x288xbf16> to vector<4x288xbf16>
    %c1_8 = arith.constant 1 : index
    %c0_9 = arith.constant 0 : index
    %c0_10 = arith.constant 0 : index
    %10 = vector.load %arg3[%c1_8, %c0_9, %c0_10] : memref<9x32x4xbf16, #tpu.memory_space<vmem>>, vector<1x32x4xbf16>
    %11 = vector.shape_cast %10 : vector<1x32x4xbf16> to vector<32x4xbf16>
    %cst_11 = arith.constant dense<0.000000e+00> : vector<32x288xf32>
    %12 = tpu.matmul %11, %9, %cst_11 {dimension_numbers = #tpu.dot_dimension_numbers<[1], [0], [0], [1], [0, 0, 1, 1], [], []>} : vector<32x4xbf16>, vector<4x288xbf16>, vector<32x288xf32> -> vector<32x288xf32>
    %13 = arith.addf %7, %12 : vector<32x288xf32>
    %c0_12 = arith.constant 0 : index
    %c0_13 = arith.constant 0 : index
    %c2 = arith.constant 2 : index
    %14 = vector.load %arg2[%c0_12, %c0_13, %c2] : memref<1x4x326xbf16, #tpu.memory_space<vmem>>, vector<1x4x288xbf16>
    %15 = vector.shape_cast %14 : vector<1x4x288xbf16> to vector<4x288xbf16>
    %c2_14 = arith.constant 2 : index
    %c0_15 = arith.constant 0 : index
    %c0_16 = arith.constant 0 : index
    %16 = vector.load %arg3[%c2_14, %c0_15, %c0_16] : memref<9x32x4xbf16, #tpu.memory_space<vmem>>, vector<1x32x4xbf16>
    %17 = vector.shape_cast %16 : vector<1x32x4xbf16> to vector<32x4xbf16>
    %cst_17 = arith.constant dense<0.000000e+00> : vector<32x288xf32>
    %18 = tpu.matmul %17, %15, %cst_17 {dimension_numbers = #tpu.dot_dimension_numbers<[1], [0], [0], [1], [0, 0, 1, 1], [], []>} : vector<32x4xbf16>, vector<4x288xbf16>, vector<32x288xf32> -> vector<32x288xf32>
    %19 = arith.addf %13, %18 : vector<32x288xf32>
    %c0_18 = arith.constant 0 : index
    %c0_19 = arith.constant 0 : index
    %c18 = arith.constant 18 : index
    %20 = vector.load %arg2[%c0_18, %c0_19, %c18] : memref<1x4x326xbf16, #tpu.memory_space<vmem>>, vector<1x4x288xbf16>
    %21 = vector.shape_cast %20 : vector<1x4x288xbf16> to vector<4x288xbf16>
    %c3 = arith.constant 3 : index
    %c0_20 = arith.constant 0 : index
    %c0_21 = arith.constant 0 : index
    %22 = vector.load %arg3[%c3, %c0_20, %c0_21] : memref<9x32x4xbf16, #tpu.memory_space<vmem>>, vector<1x32x4xbf16>
    %23 = vector.shape_cast %22 : vector<1x32x4xbf16> to vector<32x4xbf16>
    %cst_22 = arith.constant dense<0.000000e+00> : vector<32x288xf32>
    %24 = tpu.matmul %23, %21, %cst_22 {dimension_numbers = #tpu.dot_dimension_numbers<[1], [0], [0], [1], [0, 0, 1, 1], [], []>} : vector<32x4xbf16>, vector<4x288xbf16>, vector<32x288xf32> -> vector<32x288xf32>
    %25 = arith.addf %19, %24 : vector<32x288xf32>
    %c0_23 = arith.constant 0 : index
    %c0_24 = arith.constant 0 : index
    %c19 = arith.constant 19 : index
    %26 = vector.load %arg2[%c0_23, %c0_24, %c19] : memref<1x4x326xbf16, #tpu.memory_space<vmem>>, vector<1x4x288xbf16>
    %27 = vector.shape_cast %26 : vector<1x4x288xbf16> to vector<4x288xbf16>
    %c4 = arith.constant 4 : index
    %c0_25 = arith.constant 0 : index
    %c0_26 = arith.constant 0 : index
    %28 = vector.load %arg3[%c4, %c0_25, %c0_26] : memref<9x32x4xbf16, #tpu.memory_space<vmem>>, vector<1x32x4xbf16>
    %29 = vector.shape_cast %28 : vector<1x32x4xbf16> to vector<32x4xbf16>
    %cst_27 = arith.constant dense<0.000000e+00> : vector<32x288xf32>
    %30 = tpu.matmul %29, %27, %cst_27 {dimension_numbers = #tpu.dot_dimension_numbers<[1], [0], [0], [1], [0, 0, 1, 1], [], []>} : vector<32x4xbf16>, vector<4x288xbf16>, vector<32x288xf32> -> vector<32x288xf32>
    %31 = arith.addf %25, %30 : vector<32x288xf32>
    %c0_28 = arith.constant 0 : index
    %c0_29 = arith.constant 0 : index
    %c20 = arith.constant 20 : index
    %32 = vector.load %arg2[%c0_28, %c0_29, %c20] : memref<1x4x326xbf16, #tpu.memory_space<vmem>>, vector<1x4x288xbf16>
    %33 = vector.shape_cast %32 : vector<1x4x288xbf16> to vector<4x288xbf16>
    %c5 = arith.constant 5 : index
    %c0_30 = arith.constant 0 : index
    %c0_31 = arith.constant 0 : index
    %34 = vector.load %arg3[%c5, %c0_30, %c0_31] : memref<9x32x4xbf16, #tpu.memory_space<vmem>>, vector<1x32x4xbf16>
    %35 = vector.shape_cast %34 : vector<1x32x4xbf16> to vector<32x4xbf16>
    %cst_32 = arith.constant dense<0.000000e+00> : vector<32x288xf32>
    %36 = tpu.matmul %35, %33, %cst_32 {dimension_numbers = #tpu.dot_dimension_numbers<[1], [0], [0], [1], [0, 0, 1, 1], [], []>} : vector<32x4xbf16>, vector<4x288xbf16>, vector<32x288xf32> -> vector<32x288xf32>
    %37 = arith.addf %31, %36 : vector<32x288xf32>
    %c0_33 = arith.constant 0 : index
    %c0_34 = arith.constant 0 : index
    %c36 = arith.constant 36 : index
    %38 = vector.load %arg2[%c0_33, %c0_34, %c36] : memref<1x4x326xbf16, #tpu.memory_space<vmem>>, vector<1x4x288xbf16>
    %39 = vector.shape_cast %38 : vector<1x4x288xbf16> to vector<4x288xbf16>
    %c6 = arith.constant 6 : index
    %c0_35 = arith.constant 0 : index
    %c0_36 = arith.constant 0 : index
    %40 = vector.load %arg3[%c6, %c0_35, %c0_36] : memref<9x32x4xbf16, #tpu.memory_space<vmem>>, vector<1x32x4xbf16>
    %41 = vector.shape_cast %40 : vector<1x32x4xbf16> to vector<32x4xbf16>
    %cst_37 = arith.constant dense<0.000000e+00> : vector<32x288xf32>
    %42 = tpu.matmul %41, %39, %cst_37 {dimension_numbers = #tpu.dot_dimension_numbers<[1], [0], [0], [1], [0, 0, 1, 1], [], []>} : vector<32x4xbf16>, vector<4x288xbf16>, vector<32x288xf32> -> vector<32x288xf32>
    %43 = arith.addf %37, %42 : vector<32x288xf32>
    %c0_38 = arith.constant 0 : index
    %c0_39 = arith.constant 0 : index
    %c37 = arith.constant 37 : index
    %44 = vector.load %arg2[%c0_38, %c0_39, %c37] : memref<1x4x326xbf16, #tpu.memory_space<vmem>>, vector<1x4x288xbf16>
    %45 = vector.shape_cast %44 : vector<1x4x288xbf16> to vector<4x288xbf16>
    %c7 = arith.constant 7 : index
    %c0_40 = arith.constant 0 : index
    %c0_41 = arith.constant 0 : index
    %46 = vector.load %arg3[%c7, %c0_40, %c0_41] : memref<9x32x4xbf16, #tpu.memory_space<vmem>>, vector<1x32x4xbf16>
    %47 = vector.shape_cast %46 : vector<1x32x4xbf16> to vector<32x4xbf16>
    %cst_42 = arith.constant dense<0.000000e+00> : vector<32x288xf32>
    %48 = tpu.matmul %47, %45, %cst_42 {dimension_numbers = #tpu.dot_dimension_numbers<[1], [0], [0], [1], [0, 0, 1, 1], [], []>} : vector<32x4xbf16>, vector<4x288xbf16>, vector<32x288xf32> -> vector<32x288xf32>
    %49 = arith.addf %43, %48 : vector<32x288xf32>
    %c0_43 = arith.constant 0 : index
    %c0_44 = arith.constant 0 : index
    %c38 = arith.constant 38 : index
    %50 = vector.load %arg2[%c0_43, %c0_44, %c38] : memref<1x4x326xbf16, #tpu.memory_space<vmem>>, vector<1x4x288xbf16>
    %51 = vector.shape_cast %50 : vector<1x4x288xbf16> to vector<4x288xbf16>
    %c8 = arith.constant 8 : index
    %c0_45 = arith.constant 0 : index
    %c0_46 = arith.constant 0 : index
    %52 = vector.load %arg3[%c8, %c0_45, %c0_46] : memref<9x32x4xbf16, #tpu.memory_space<vmem>>, vector<1x32x4xbf16>
    %53 = vector.shape_cast %52 : vector<1x32x4xbf16> to vector<32x4xbf16>
    %cst_47 = arith.constant dense<0.000000e+00> : vector<32x288xf32>
    %54 = tpu.matmul %53, %51, %cst_47 {dimension_numbers = #tpu.dot_dimension_numbers<[1], [0], [0], [1], [0, 0, 1, 1], [], []>} : vector<32x4xbf16>, vector<4x288xbf16>, vector<32x288xf32> -> vector<32x288xf32>
    %55 = arith.addf %49, %54 : vector<32x288xf32>
    %c0_48 = arith.constant 0 : index
    %c0_49 = arith.constant 0 : index
    %c0_50 = arith.constant 0 : index
    %56 = vector.load %arg5[%c0_48, %c0_49, %c0_50] : memref<1x1x288xf32, #tpu.memory_space<vmem>>, vector<1x1x288xf32>
    %57 = vector.shape_cast %56 : vector<1x1x288xf32> to vector<1x288xf32>
    %c0_51 = arith.constant 0 : index
    %c0_52 = arith.constant 0 : index
    %58 = vector.load %arg4[%c0_51, %c0_52] : memref<32x1xf32, #tpu.memory_space<vmem>>, vector<32x1xf32>
    %59 = vector.broadcast %58 : vector<32x1xf32> to vector<32x288xf32>
    %60 = arith.subf %55, %59 : vector<32x288xf32>
    %c0_53 = arith.constant 0 : index
    %c0_54 = arith.constant 0 : index
    %c0_55 = arith.constant 0 : index
    %61 = vector.load %arg6[%c0_53, %c0_54, %c0_55] : memref<1x32x1xf32, #tpu.memory_space<vmem>>, vector<1x32x1xf32>
    %62 = vector.broadcast %57 : vector<1x288xf32> to vector<32x288xf32>
    %63 = arith.mulf %55, %62 : vector<32x288xf32>
    %cst_56 = arith.constant dense<0.000000e+00> : vector<32xf32>
    %64 = vector.multi_reduction <add>, %63, %cst_56 [1] : vector<32x288xf32> to vector<32xf32>
    %65 = vector.shape_cast %64 : vector<32xf32> to vector<32x1xf32>
    %66 = vector.shape_cast %65 : vector<32x1xf32> to vector<1x32x1xf32>
    %67 = arith.addf %61, %66 : vector<1x32x1xf32>
    %c0_57 = arith.constant 0 : index
    %c0_58 = arith.constant 0 : index
    %c0_59 = arith.constant 0 : index
    %68 = vector.load %arg6[%c0_57, %c0_58, %c0_59] : memref<1x32x1xf32, #tpu.memory_space<vmem>>, vector<1x32x1xf32>
    tpu.vector_store %arg6[%c0_57, %c0_58, %c0_59], %67 {strides = array<i32>} : memref<1x32x1xf32, #tpu.memory_space<vmem>>, vector<1x32x1xf32>,
    %c0_60 = arith.constant 0 : index
    %c0_61 = arith.constant 0 : index
    %c0_62 = arith.constant 0 : index
    %69 = vector.load %arg7[%c0_60, %c0_61, %c0_62] : memref<1x32x1xf32, #tpu.memory_space<vmem>>, vector<1x32x1xf32>
    %70 = arith.mulf %60, %60 : vector<32x288xf32>
    %71 = vector.broadcast %57 : vector<1x288xf32> to vector<32x288xf32>
    %72 = arith.mulf %70, %71 : vector<32x288xf32>
    %cst_63 = arith.constant dense<0.000000e+00> : vector<32xf32>
    %73 = vector.multi_reduction <add>, %72, %cst_63 [1] : vector<32x288xf32> to vector<32xf32>
    %74 = vector.shape_cast %73 : vector<32xf32> to vector<32x1xf32>
    %75 = vector.shape_cast %74 : vector<32x1xf32> to vector<1x32x1xf32>
    %76 = arith.addf %69, %75 : vector<1x32x1xf32>
    %c0_64 = arith.constant 0 : index
    %c0_65 = arith.constant 0 : index
    %c0_66 = arith.constant 0 : index
    %77 = vector.load %arg7[%c0_64, %c0_65, %c0_66] : memref<1x32x1xf32, #tpu.memory_space<vmem>>, vector<1x32x1xf32>
    tpu.vector_store %arg7[%c0_64, %c0_65, %c0_66], %76 {strides = array<i32>} : memref<1x32x1xf32, #tpu.memory_space<vmem>>, vector<1x32x1xf32>,
    return
  }
  func.func @transform_0(%arg0: i32, %arg1: i32) -> (i32, i32, i32) {
    %c1_i32 = arith.constant 1 : i32
    %0 = arith.muli %arg0, %c1_i32 : i32
    %1 = arith.addi %0, %arg1 : i32
    %c0_i32 = arith.constant 0 : i32
    %c0_i32_0 = arith.constant 0 : i32
    %c0_i32_1 = arith.constant 0 : i32
    return %1, %c0_i32, %c0_i32_0 : i32, i32, i32
  }
  func.func @transform_1(%arg0: i32, %arg1: i32) -> (i32, i32, i32) {
    %c0_i32 = arith.constant 0 : i32
    %c0_i32_0 = arith.constant 0 : i32
    %c0_i32_1 = arith.constant 0 : i32
    %c0_i32_2 = arith.constant 0 : i32
    return %c0_i32, %c0_i32_0, %c0_i32_1 : i32, i32, i32
  }
  func.func @transform_2(%arg0: i32, %arg1: i32) -> (i32, i32) {
    %c0_i32 = arith.constant 0 : i32
    %c0_i32_0 = arith.constant 0 : i32
    %c0_i32_1 = arith.constant 0 : i32
    return %c0_i32, %c0_i32_0 : i32, i32
  }
  func.func @transform_3(%arg0: i32, %arg1: i32) -> (i32, i32, i32) {
    %c1_i32 = arith.constant 1 : i32
    %0 = arith.muli %arg0, %c1_i32 : i32
    %1 = arith.addi %0, %arg1 : i32
    %c0_i32 = arith.constant 0 : i32
    %c0_i32_0 = arith.constant 0 : i32
    %c0_i32_1 = arith.constant 0 : i32
    return %1, %c0_i32, %c0_i32_0 : i32, i32, i32
  }
  func.func @transform_4(%arg0: i32, %arg1: i32) -> (i32, i32, i32) {
    %c0_i32 = arith.constant 0 : i32
    %c0_i32_0 = arith.constant 0 : i32
    %c0_i32_1 = arith.constant 0 : i32
    return %arg0, %c0_i32, %c0_i32_0 : i32, i32, i32
  }
  func.func @transform_5(%arg0: i32, %arg1: i32) -> (i32, i32, i32) {
    %c0_i32 = arith.constant 0 : i32
    %c0_i32_0 = arith.constant 0 : i32
    %c0_i32_1 = arith.constant 0 : i32
    return %arg0, %c0_i32, %c0_i32_0 : i32, i32, i32
  }
}

</mosaic_0001>

<bundles_post_ra>
// kernel: tpu_custom_call.1
= control target key start
LH: loop header
LB: loop body
LE: loop exit
PB: predicated region body
PF: predicated region fallthrough
CT: control target
= control target key end

     0   :  { %s2376_s18 = smov 0   ;;  %s2378_s19 = smov 0   ;;  %s2850_s0 = inlined_call_operand.vmem [shape: bf16[2,4,326], index: 0, kind: input, shape index: {}]   ;;  %s2851_s1 = inlined_call_operand.vmem [shape: bf16[9,32,4], index: 1, kind: input, shape index: {}]   ;;  %s2852_s2 = inlined_call_operand.vmem [shape: f32[32,1], index: 2, kind: input, shape index: {}]   ;;  %s2853_s3 = inlined_call_operand.vmem [shape: f32[2,1,288], index: 3, kind: input, shape index: {}]   ;;  %s2854_s4 = inlined_call_operand.vmem [shape: f32[2,32,1], index: 4, kind: output, shape index: {0}]   ;;  %s2855_s5 = inlined_call_operand.vmem [shape: f32[2,32,1], index: 5, kind: output, shape index: {1}]  }
   0x1   :  { %s2380_s20 = smov 0  }
   0x2 LB: > { %s28_s21 = sadd.s32 1, %s2329_s19  ;;  %p2051_p0 = scmp.ge.s32.totalorder %s2333_s20, 1  ;;  %s2333_s20 = sphi %s2380_s20, %s16_s20   ;;  %s2329_s19 = sphi %s2378_s19, %s2892_s19   ;;  %s2325_s18 = sphi %s2376_s18, %s2891_s18  }
   0x3   : > { %p30_p1 = scmp.ge.s32.totalorder %s28_s21, 2  ;;  %p219_p2 = scmp.lt.s32.totalorder %s2333_s20, 3 }
   0x5   : > { %s2894_s21 = smov (%p30_p1, %s28_s21), 0  ;;  %p220_p3 = pnand %p2051_p0, %p219_p2 }
   0x7   : > { %223 = sbr.rel (%p220_p3) target bundleno = 602 (0x25a), region = 36 }
   0xc   : > { %p259_p4 = scmp.lt.s32.totalorder %s2325_s18, 1  ;;  %v320_v0 = vlaneseq  ;;  %v2335_v1 = vmov 1983009808   ;;  %v2399_v4 = vld [vmem:[%s2851_s1 + $0x10] sm:$0xff]   ;;  %vm341_vm0 = vcmask 31744   ;;  %v2336_v8 = vmov 0  }
   0xd   : > { %v318_v2 = vunpack.c.l.s4 %v2335_v1  ;;  %2185 = vmatprep.mubr.msk.bf16.mxu1 %vm341_vm0, %v2399_v4  ;;  %390 = vmatprep.mubr.bf16.mxu0 %v2336_v8  ;;  %s2337_s7 = smov 127   ;;  %s2338_s8 = smov 126   ;;  %v1786_v55 = vld [vmem:[%s2852_s2 + $0x8] sm:$0xff]  ;;  %v1785_v56 = vld [vmem:[%s2852_s2] sm:$0xff]  ;;  %v1787_v57 = vld [vmem:[%s2852_s2 + $0x10] sm:$0xff]  ;;  %vm348_vm1 = vcmask 1041408  }
   0xe   : > { %s2896_s18 = smov (!%p259_p4, %s2325_s18), 1  ;;  %v321_v3 = vshrl.u32 %v320_v0, 7  ;;  %2284 = vset.pattern.permute.xlu1 %v2336_v8  ;;  %2283 = vset.pattern.permute.xlu0 %v2336_v8  ;;  %s2339_s9 = smov 110   ;;  %v1788_v58 = vld [vmem:[%s2852_s2 + $0x18] sm:$0xff]  ;;  %vm338_vm2 = vcmask 1039360   ;;  %vm626_vm3 = vcmask 1031168  }
   0xf   : > { %v319_v5 = vunpack.c.0.s8 %v318_v2  ;;  %s2246_s24 = smul.u32 6, %s2896_s18  ;;  %s2340_s10 = smov 109   ;;  %v2294_v62 = vld [vmem:[%s2851_s1 + $0x18] sm:$0xff]   ;;  %vm797_vm4 = vcmask 900096   ;;  %vm968_vm5 = vcmask 891904   ;;  %vm1139_vm6 = vcmask 883712  }
  0x10   : > { %v1828_v6 = vsub.s32 0, %v321_v3  ;;  %v1832_v7 = vsub.s32 1, %v321_v3  ;;  %s2247_s25 = smul.u32 3, %s2896_s18  ;;  %v1836_v10 = vsub.s32 2, %v321_v3  ;;  %s2341_s11 = smov 108   ;;  %vm1310_vm7 = vcmask 752640  }
  0x11   : > { %v2406_v9 = vsub.s32 %v319_v5, %v321_v3  ;;  %s2413_s28 = scalar_lea.vmem %s2850_s0, %s2246_s24  ;;  %s2342_s12 = smov 92   ;;  %vm1481_vm8 = vcmask 744448   ;;  %vm1652_vm9 = vcmask 736256   ;;  %vm286_vm10 = vcmask 7168  }
  0x12   : > { %s269_s6 = scalar_lea.vmem %s2853_s3, %s2247_s25  ;;  %v295_v11 = vld [vmem:[%s2413_s28] sm:$0x3f]  ;;  %s2343_s13 = smov 91   ;;  %vm1854_vm11 = vcmask 261120  }
  0x13   : > { %v2420_v12 = vrot.slane %v295_v11, %v2406_v9  ;;  %v1784_v13 = vld [vmem:[%s269_s6] sm:$0x7]  ;;  %v316_v14 = vcombine.high %v295_v11, %v295_v11  ;;  %s2344_s14 = smov 90   ;;  %s2154_s15 = sshll.u32 %s2896_s18, 5 }
  0x14   : > { %v2422_v15 = vrot.slane %v1784_v13, %v1828_v6  ;;  %v2424_v16 = vrot.slane %v1784_v13, %v1832_v7  ;;  %v2426_v17 = vrot.slane %v1784_v13, %v1836_v10  ;;  %v587_v18 = vld [vmem:[%s2413_s28] sm:$0x3f]  ;;  %s2633_s22 = scalar_lea.vmem %s2854_s4, %s2154_s15  ;;  %s2638_s25 = scalar_lea.vmem %s2855_s5, %s2154_s15 }
  0x15   : > { %332 = vrot.lane.b32.xlu0 %v2420_v12, %s2337_s7  ;;  %v2431_v19 = vrot.slane %v316_v14, %v2406_v9  ;;  %v2435_v20 = vcombine.high %v2420_v12, %v2420_v12  ;;  %v611_v21 = vrot.slane %v587_v18, %v2406_v9  ;;  %v604_v22 = vcombine.high %v587_v18, %v587_v18  ;;  %v758_v24 = vld [vmem:[%s2413_s28] sm:$0x3f] }
  0x16   : > { %2859 = vst [vmem:[#allocation2_spill] sm:$0xff] %v2422_v15  ;;  %2860 = vst [vmem:[#allocation3_spill] sm:$0xff] %v2424_v16  ;;  %v782_v26 = vrot.slane %v758_v24, %v2406_v9  ;;  %v775_v27 = vcombine.high %v758_v24, %v758_v24  ;;  %v929_v29 = vld [vmem:[%s2413_s28] sm:$0x3f]  ;;  %v477_v2 = vsel %vm348_vm1, %v2420_v12, 0 }
  0x17   : > { %2861 = vst [vmem:[#allocation4_spill] sm:$0xff] %v2426_v17  ;;  %336 = vrot.lane.b32.xlu1 %v2431_v19, %s2337_s7  ;;  %v619_v23 = vcombine.high %v611_v21, %v611_v21  ;;  %v618_v25 = vrot.slane %v604_v22, %v2406_v9  ;;  %v953_v31 = vrot.slane %v929_v29, %v2406_v9  ;;  %v1100_v34 = vld [vmem:[%s2413_s28] sm:$0x3f]  ;;  %v483_v6 = vsel %vm348_vm1, %v2431_v19, 0 }
  0x18   : > { %v790_v28 = vcombine.high %v782_v26, %v782_v26  ;;  %v789_v30 = vrot.slane %v775_v27, %v2406_v9  ;;  %v946_v32 = vcombine.high %v929_v29, %v929_v29  ;;  %v1124_v36 = vrot.slane %v1100_v34, %v2406_v9  ;;  %v1271_v39 = vld [vmem:[%s2413_s28] sm:$0x3f] }
  0x19   : > { %334 = vrot.lane.b32.xlu0 %v2435_v20, %s2337_s7  ;;  %v961_v33 = vcombine.high %v953_v31, %v953_v31  ;;  %v1117_v37 = vcombine.high %v1100_v34, %v1100_v34  ;;  %v1295_v41 = vrot.slane %v1271_v39, %v2406_v9  ;;  %v1288_v42 = vcombine.high %v1271_v39, %v1271_v39  ;;  %v1442_v44 = vld [vmem:[%s2413_s28] sm:$0x3f] }
  0x1a   : > { %v960_v35 = vrot.slane %v946_v32, %v2406_v9  ;;  %v1132_v38 = vcombine.high %v1124_v36, %v1124_v36  ;;  %v1466_v46 = vrot.slane %v1442_v44, %v2406_v9  ;;  %v1459_v47 = vcombine.high %v1442_v44, %v1442_v44  ;;  %v1613_v49 = vld [vmem:[%s2413_s28] sm:$0x3f]  ;;  %v2299_v32 = vld [vmem:[%s2851_s1 + $0x30] sm:$0xff]   ;;  %v2302_v44 = vld [vmem:[%s2851_s1 + $0x48] sm:$0xff]  }
  0x1b   : > { %620 = vrot.lane.b32.xlu1 %v611_v21, %s2338_s8  ;;  %v1131_v40 = vrot.slane %v1117_v37, %v2406_v9  ;;  %v1303_v43 = vcombine.high %v1295_v41, %v1295_v41  ;;  %v1302_v45 = vrot.slane %v1288_v42, %v2406_v9  ;;  %v1637_v51 = vrot.slane %v1613_v49, %v2406_v9  ;;  %v2295_v10 = vld [vmem:[%s2851_s1] sm:$0xff]   ;;  %v2300_v37 = vld [vmem:[%s2851_s1 + $0x38] sm:$0xff]  }
  0x1c   : > { %v1474_v48 = vcombine.high %v1466_v46, %v1466_v46  ;;  %v1473_v50 = vrot.slane %v1459_v47, %v2406_v9  ;;  %v1630_v52 = vcombine.high %v1613_v49, %v1613_v49 }
  0x1d   : > { %622 = vrot.lane.b32.xlu0 %v619_v23, %s2338_s8  ;;  %v1645_v53 = vcombine.high %v1637_v51, %v1637_v51 }
  0x1e   : > { %v1644_v54 = vrot.slane %v1630_v52, %v2406_v9 }
  0x1f   : > { %624 = vrot.lane.b32.xlu1 %v618_v25, %s2338_s8 }
  0x21   : > { %791 = vrot.lane.b32.xlu0 %v782_v26, %s2339_s9  ;;  %v2298_v26 = vld [vmem:[%s2851_s1 + $0x28] sm:$0xff]  }
  0x23   : > { %793 = vrot.lane.b32.xlu1 %v790_v28, %s2339_s9 }
  0x25   : > { %795 = vrot.lane.b32.xlu0 %v789_v30, %s2339_s9 }
  0x27   : > { %962 = vrot.lane.b32.xlu1 %v953_v31, %s2340_s10 }
  0x29   : > { %964 = vrot.lane.b32.xlu0 %v961_v33, %s2340_s10 }
  0x2b   : > { %966 = vrot.lane.b32.xlu1 %v960_v35, %s2340_s10 }
  0x2d   : > { %1133 = vrot.lane.b32.xlu0 %v1124_v36, %s2341_s11 }
  0x2f   : > { %1135 = vrot.lane.b32.xlu1 %v1132_v38, %s2341_s11  ;;  %v2301_v38 = vld [vmem:[%s2851_s1 + $0x40] sm:$0xff]  }
  0x31   : > { %1137 = vrot.lane.b32.xlu0 %v1131_v40, %s2341_s11 }
  0x33   : > { %1304 = vrot.lane.b32.xlu1 %v1295_v41, %s2342_s12 }
  0x35   : > { %1306 = vrot.lane.b32.xlu0 %v1303_v43, %s2342_s12 }
  0x37   : > { %1308 = vrot.lane.b32.xlu1 %v1302_v45, %s2342_s12 }
  0x39   : > { %1475 = vrot.lane.b32.xlu0 %v1466_v46, %s2343_s13 }
  0x3b   : > { %1477 = vrot.lane.b32.xlu1 %v1474_v48, %s2343_s13 }
  0x3d   : > { %1479 = vrot.lane.b32.xlu0 %v1473_v50, %s2343_s13  ;;  %v2303_v50 = vld [vmem:[%s2851_s1 + $0x50] sm:$0xff]  }
  0x3f   : > { %1646 = vrot.lane.b32.xlu1 %v1637_v51, %s2344_s14 }
  0x41   : > { %1648 = vrot.lane.b32.xlu0 %v1645_v53, %s2344_s14 }
  0x43   : > { %1650 = vrot.lane.b32.xlu1 %v1644_v54, %s2344_s14 }
  0x45   : > { %1791 = vperm.xlu0 %2283, %v1785_v56   ;;  %v2305_v56 = vld [vmem:[%s2851_s1 + $0x60] sm:$0xff]  }
  0x47   : > { %1796 = vperm.xlu1 %2284, %v1786_v55   ;;  %v2304_v55 = vld [vmem:[%s2851_s1 + $0x58] sm:$0xff]  }
  0x49   : > { %1806 = vperm.xlu0 %2283, %v1788_v58  }
  0x4b   : > { %1801 = vperm.xlu1 %2284, %v1787_v57  }
  0x87   : > { %v333_v59 = vpop.permute.xlu0 %332 }
  0x89   : > { %v337_v60 = vpop.permute.xlu1 %336 }
  0x8a   : > { %2237 = vmatprep.subr.msk.bf16.mxu1 %vm348_vm1, %v337_v60  ;;  %v356_v61 = vsel %vm348_vm1, %v337_v60, 0 }
  0x8b   : > { %v335_v63 = vpop.permute.xlu0 %334  ;;  %2184 = vmatpush3.bf16.msra.mxu1 %v356_v61  ;;  %v2306_v61 = vld [vmem:[%s2851_s1 + $0x68] sm:$0xff]  }
  0x8c   : > { %v340_v0 = vsel %vm338_vm2, %v335_v63, %v337_v60  ;;  %v339_v1 = vsel %vm338_vm2, %v333_v59, %v335_v63  ;;  %2070 = vmatprep.subr.msk.bf16.mxu1 %vm348_vm1, %v2435_v20  ;;  %v2297_v20 = vld [vmem:[%s2851_s1 + $0x20] sm:$0xff]  }
  0x8d   : > { %2063 = vmatprep.subr.msk.bf16.mxu0 %vm348_vm1, %v340_v0  ;;  %v350_v3 = vsel %vm348_vm1, %v339_v1, 0  ;;  %v621_v5 = vpop.permute.xlu1 %620 }
  0x8e   : > { %373 = vmatpush1.bf16.msra.mxu0 %v350_v3  ;;  %2186 = vmatmul.mubr.msk.bf16.vlgmr.msra.gmra.mxu1 %vm341_vm0, %v2294_v62  ;;  %v2307_v3 = vld [vmem:[%s2851_s1 + $0x70] sm:$0xff]  }
  0x8f   : > { %2238 = vmatprep.subr.msk.bf16.mxu0 %vm348_vm1, %v2431_v19  ;;  %500 = vmatpush1.bf16.msra.mxu1 %v477_v2  ;;  %v623_v7 = vpop.permute.xlu0 %622  ;;  %v2296_v19 = vld [vmem:[%s2851_s1 + $0x8] sm:$0xff]  }
  0x90   : > { %517 = vmatprep.mubr.bf16.mxu1 %v2336_v8  ;;  %v627_v21 = vsel %vm626_vm3, %v621_v5, %v623_v7 }
  0x91   : > { %2064 = vmatmul.mubr.msk.bf16.vlgmr.msra.gmra.mxu0 %vm341_vm0, %v2399_v4  ;;  %v625_v9 = vpop.permute.xlu1 %624  ;;  %v636_v23 = vsel %vm348_vm1, %v627_v21, 0 }
  0x92   : > { %2190 = vmatpush3.bf16.msra.mxu0 %v483_v6  ;;  %400 = vmatprep.mubr.bf16.mxu0 %v2336_v8  ;;  %v628_v11 = vsel %vm626_vm3, %v623_v7, %v625_v9  ;;  %v642_v13 = vsel %vm348_vm1, %v625_v9, 0  ;;  %v2308_v6 = vld [vmem:[%s2851_s1 + $0x78] sm:$0xff]   ;;  %v2309_v7 = vld [vmem:[%s2851_s1 + $0x80] sm:$0xff]  }
  0x93   : > { %2239 = vmatprep.subr.msk.bf16.mxu1 %vm348_vm1, %v625_v9  ;;  %2081 = vmatprep.subr.msk.bf16.mxu0 %vm348_vm1, %v628_v11  ;;  %v792_v12 = vpop.permute.xlu0 %791  ;;  %v2310_v11 = vld [vmem:[%s2851_s1 + $0x88] sm:$0xff]  }
  0x95   : > { %v794_v14 = vpop.permute.xlu1 %793 }
  0x96   : > { %2071 = vmatmul.mubr.msk.bf16.vlgmr.msra.gmra.mxu1 %vm341_vm0, %v2295_v10  ;;  %v798_v25 = vsel %vm797_vm4, %v792_v12, %v794_v14  ;;  %v2345_v12 = vmov 0.0  }
  0x97   : > { %2196 = vmatpush3.bf16.msra.mxu1 %v642_v13  ;;  %527 = vmatprep.mubr.bf16.mxu1 %v2336_v8  ;;  %v796_v4 = vpop.permute.xlu0 %795  ;;  %v807_v27 = vsel %vm348_vm1, %v798_v25, 0  ;;  %287 = vst.msk [vmem:[%s2633_s22] sm:$0xff] %vm286_vm10, %v2345_v12  ;;  %288 = vst.msk [vmem:[%s2633_s22 + $0x8] sm:$0xff] %vm286_vm10, %v2345_v12 }
  0x98   : > { %v799_v18 = vsel %vm797_vm4, %v794_v14, %v796_v4  ;;  %v813_v30 = vsel %vm348_vm1, %v796_v4, 0  ;;  %289 = vst.msk [vmem:[%s2633_s22 + $0x10] sm:$0xff] %vm286_vm10, %v2345_v12  ;;  %290 = vst.msk [vmem:[%s2633_s22 + $0x18] sm:$0xff] %vm286_vm10, %v2345_v12 }
  0x99   : > { %2065 = vmatmul.mubr.msk.bf16.gmra.mxu0 %vm341_vm0, %v2294_v62  ;;  %2092 = vmatprep.subr.msk.bf16.mxu1 %vm348_vm1, %v799_v18  ;;  %v963_v24 = vpop.permute.xlu1 %962  ;;  %291 = vst.msk [vmem:[%s2638_s25] sm:$0xff] %vm286_vm10, %v2345_v12  ;;  %292 = vst.msk [vmem:[%s2638_s25 + $0x8] sm:$0xff] %vm286_vm10, %v2345_v12 }
  0x9a   : > { %2191 = vmatprep.mubr.msk.bf16.mxu0 %vm341_vm0, %v2295_v10  ;;  %293 = vst.msk [vmem:[%s2638_s25 + $0x10] sm:$0xff] %vm286_vm10, %v2345_v12  ;;  %294 = vst.msk [vmem:[%s2638_s25 + $0x18] sm:$0xff] %vm286_vm10, %v2345_v12 }
  0x9b   : > { %v965_v22 = vpop.permute.xlu0 %964 }
  0x9c   : > { %v969_v39 = vsel %vm968_vm5, %v963_v24, %v965_v22 }
  0x9d   : > { %v967_v29 = vpop.permute.xlu1 %966  ;;  %v978_v41 = vsel %vm348_vm1, %v969_v39, 0 }
  0x9e   : > { %2072 = vmatmul.mubr.msk.bf16.gmra.mxu1 %vm341_vm0, %v2296_v19  ;;  %v970_v31 = vsel %vm968_vm5, %v965_v22, %v967_v29  ;;  %v984_v35 = vsel %vm348_vm1, %v967_v29, 0 }
  0x9f   : > { %2197 = vmatprep.mubr.msk.bf16.mxu1 %vm341_vm0, %v2297_v20  ;;  %v1134_v28 = vpop.permute.xlu0 %1133 }
  0xa1   : > { %2192 = vmatmul.mubr.msk.bf16.vlgmr.msra.gmra.mxu0 %vm341_vm0, %v2296_v19  ;;  %v1136_v34 = vpop.permute.xlu1 %1135 }
  0xa2   : > { %659 = vmatpush1.bf16.msra.mxu0 %v636_v23  ;;  %676 = vmatprep.mubr.bf16.mxu0 %v2336_v8  ;;  %v1140_v43 = vsel %vm1139_vm6, %v1134_v28, %v1136_v34 }
  0xa3   : > { %2240 = vmatprep.subr.msk.bf16.mxu0 %vm348_vm1, %v796_v4  ;;  %v1138_v33 = vpop.permute.xlu0 %1137  ;;  %v1149_v45 = vsel %vm348_vm1, %v1140_v43, 0 }
  0xa4   : > { %v1141_v36 = vsel %vm1139_vm6, %v1136_v34, %v1138_v33  ;;  %v1155_v48 = vsel %vm348_vm1, %v1138_v33, 0 }
  0xa5   : > { %v1305_v42 = vpop.permute.xlu1 %1304 }
  0xa6   : > { %2198 = vmatmul.mubr.msk.bf16.vlgmr.msra.gmra.mxu1 %vm341_vm0, %v2298_v26 }
  0xa7   : > { %830 = vmatpush1.bf16.msra.mxu1 %v807_v27  ;;  %847 = vmatprep.mubr.bf16.mxu1 %v2336_v8  ;;  %v1307_v40 = vpop.permute.xlu0 %1306 }
  0xa8   : > { %2241 = vmatprep.subr.msk.bf16.mxu1 %vm348_vm1, %v967_v29  ;;  %v1311_v57 = vsel %vm1310_vm7, %v1305_v42, %v1307_v40 }
  0xa9   : > { %2082 = vmatmul.mubr.msk.bf16.vlgmr.msra.gmra.mxu0 %vm341_vm0, %v2297_v20  ;;  %v1309_v47 = vpop.permute.xlu1 %1308  ;;  %v1320_v58 = vsel %vm348_vm1, %v1311_v57, 0 }
  0xaa   : > { %2202 = vmatpush3.bf16.msra.mxu0 %v813_v30  ;;  %686 = vmatprep.mubr.bf16.mxu0 %v2336_v8  ;;  %v1312_v49 = vsel %vm1310_vm7, %v1307_v40, %v1309_v47  ;;  %v1326_v53 = vsel %vm348_vm1, %v1309_v47, 0 }
  0xab   : > { %2103 = vmatprep.subr.msk.bf16.mxu0 %vm348_vm1, %v970_v31  ;;  %v1476_v46 = vpop.permute.xlu0 %1475 }
  0xad   : > { %v1478_v52 = vpop.permute.xlu1 %1477 }
  0xae   : > { %2093 = vmatmul.mubr.msk.bf16.vlgmr.msra.gmra.mxu1 %vm341_vm0, %v2299_v32  ;;  %v1482_v60 = vsel %vm1481_vm8, %v1476_v46, %v1478_v52 }
  0xaf   : > { %2208 = vmatpush3.bf16.msra.mxu1 %v984_v35  ;;  %857 = vmatprep.mubr.bf16.mxu1 %v2336_v8  ;;  %v1480_v51 = vpop.permute.xlu0 %1479  ;;  %v1491_v62 = vsel %vm348_vm1, %v1482_v60, 0 }
  0xb0   : > { %2114 = vmatprep.subr.msk.bf16.mxu1 %vm348_vm1, %v1141_v36  ;;  %v1483_v54 = vsel %vm1481_vm8, %v1478_v52, %v1480_v51  ;;  %v1497_v1 = vsel %vm348_vm1, %v1480_v51, 0 }
  0xb1   : > { %2083 = vmatmul.mubr.msk.bf16.gmra.mxu0 %vm341_vm0, %v2298_v26  ;;  %v1647_v59 = vpop.permute.xlu1 %1646 }
  0xb2   : > { %2203 = vmatprep.mubr.msk.bf16.mxu0 %vm341_vm0, %v2299_v32 }
  0xb3   : > { %v1649_v63 = vpop.permute.xlu0 %1648 }
  0xb4   : > { %v1653_v9 = vsel %vm1652_vm9, %v1647_v59, %v1649_v63 }
  0xb5   : > { %v1651_v0 = vpop.permute.xlu1 %1650  ;;  %v1662_v10 = vsel %vm348_vm1, %v1653_v9, 0 }
  0xb6   : > { %2094 = vmatmul.mubr.msk.bf16.gmra.mxu1 %vm341_vm0, %v2300_v37  ;;  %v1654_v2 = vsel %vm1652_vm9, %v1649_v63, %v1651_v0  ;;  %v1668_v5 = vsel %vm348_vm1, %v1651_v0, 0 }
  0xb7   : > { %2209 = vmatprep.mubr.msk.bf16.mxu1 %vm341_vm0, %v2301_v38 }
  0xb9   : > { %2204 = vmatmul.mubr.msk.bf16.vlgmr.msra.gmra.mxu0 %vm341_vm0, %v2300_v37 }
  0xba   : > { %1001 = vmatpush1.bf16.msra.mxu0 %v978_v41  ;;  %1018 = vmatprep.mubr.bf16.mxu0 %v2336_v8 }
  0xbb   : > { %2242 = vmatprep.subr.msk.bf16.mxu0 %vm348_vm1, %v1138_v33 }
  0xbe   : > { %2210 = vmatmul.mubr.msk.bf16.vlgmr.msra.gmra.mxu1 %vm341_vm0, %v2302_v44 }
  0xbf   : > { %1172 = vmatpush1.bf16.msra.mxu1 %v1149_v45  ;;  %1189 = vmatprep.mubr.bf16.mxu1 %v2336_v8 }
  0xc0   : > { %2243 = vmatprep.subr.msk.bf16.mxu1 %vm348_vm1, %v1309_v47 }
  0xc1   : > { %2104 = vmatmul.mubr.msk.bf16.vlgmr.msra.gmra.mxu0 %vm341_vm0, %v2301_v38 }
  0xc2   : > { %2214 = vmatpush3.bf16.msra.mxu0 %v1155_v48  ;;  %1028 = vmatprep.mubr.bf16.mxu0 %v2336_v8 }
  0xc3   : > { %2125 = vmatprep.subr.msk.bf16.mxu0 %vm348_vm1, %v1312_v49 }
  0xc6   : > { %2115 = vmatmul.mubr.msk.bf16.vlgmr.msra.gmra.mxu1 %vm341_vm0, %v2303_v50 }
  0xc7   : > { %2220 = vmatpush3.bf16.msra.mxu1 %v1326_v53  ;;  %1199 = vmatprep.mubr.bf16.mxu1 %v2336_v8 }
  0xc8   : > { %2136 = vmatprep.subr.msk.bf16.mxu1 %vm348_vm1, %v1483_v54 }
  0xc9   : > { %2105 = vmatmul.mubr.msk.bf16.gmra.mxu0 %vm341_vm0, %v2302_v44 }
  0xca   : > { %2215 = vmatprep.mubr.msk.bf16.mxu0 %vm341_vm0, %v2303_v50 }
  0xce   : > { %2116 = vmatmul.mubr.msk.bf16.gmra.mxu1 %vm341_vm0, %v2304_v55 }
  0xcf   : > { %2221 = vmatprep.mubr.msk.bf16.mxu1 %vm341_vm0, %v2305_v56 }
  0xd1   : > { %2216 = vmatmul.mubr.msk.bf16.vlgmr.msra.gmra.mxu0 %vm341_vm0, %v2304_v55 }
  0xd2   : > { %1343 = vmatpush1.bf16.msra.mxu0 %v1320_v58  ;;  %1360 = vmatprep.mubr.bf16.mxu0 %v2336_v8 }
  0xd3   : > { %2244 = vmatprep.subr.msk.bf16.mxu0 %vm348_vm1, %v1480_v51 }
  0xd6   : > { %2222 = vmatmul.mubr.msk.bf16.vlgmr.msra.gmra.mxu1 %vm341_vm0, %v2306_v61 }
  0xd7   : > { %1514 = vmatpush1.bf16.msra.mxu1 %v1491_v62  ;;  %1531 = vmatprep.mubr.bf16.mxu1 %v2336_v8 }
  0xd8   : > { %2245 = vmatprep.subr.msk.bf16.mxu1 %vm348_vm1, %v1651_v0 }
  0xd9   : > { %2126 = vmatmul.mubr.msk.bf16.vlgmr.msra.gmra.mxu0 %vm341_vm0, %v2305_v56 }
  0xda   : > { %2226 = vmatpush3.bf16.msra.mxu0 %v1497_v1  ;;  %1370 = vmatprep.mubr.bf16.mxu0 %v2336_v8 }
  0xdb   : > { %2147 = vmatprep.subr.msk.bf16.mxu0 %vm348_vm1, %v1654_v2 }
  0xde   : > { %2137 = vmatmul.mubr.msk.bf16.vlgmr.msra.gmra.mxu1 %vm341_vm0, %v2307_v3 }
  0xdf   : > { %2232 = vmatpush3.bf16.msra.mxu1 %v1668_v5  ;;  %1541 = vmatprep.mubr.bf16.mxu1 %v2336_v8 }
  0xe1   : > { %2127 = vmatmul.mubr.msk.bf16.gmra.mxu0 %vm341_vm0, %v2306_v61 }
  0xe2   : > { %2227 = vmatprep.mubr.msk.bf16.mxu0 %vm341_vm0, %v2307_v3 }
  0xe6   : > { %2138 = vmatmul.mubr.msk.bf16.gmra.mxu1 %vm341_vm0, %v2308_v6 }
  0xe7   : > { %2233 = vmatprep.mubr.msk.bf16.mxu1 %vm341_vm0, %v2309_v7 }
  0xe9   : > { %2228 = vmatmul.mubr.msk.bf16.vlgmr.msra.gmra.mxu0 %vm341_vm0, %v2308_v6 }
  0xea   : > { %1685 = vmatpush1.bf16.msra.mxu0 %v1662_v10  ;;  %1702 = vmatprep.mubr.bf16.mxu0 %v2336_v8 }
  0xee   : > { %2234 = vmatmul.mubr.msk.bf16.vlgmr.msra.gmra.mxu1 %vm341_vm0, %v2310_v11 }
  0xf1   : > { %2148 = vmatmul.mubr.msk.bf16.vlgmr.msra.gmra.mxu0 %vm341_vm0, %v2309_v7 }
  0xf2   : > { %1712 = vmatprep.mubr.bf16.mxu0 %v2336_v8 }
  0xf9   : > { %2149 = vmatmul.mubr.msk.bf16.gmra.mxu0 %vm341_vm0, %v2310_v11 }
 0x14e   : > { %v2187_v8 = vpop.f32.mrf.mxu1 }
 0x150   : > { %v445_v13 = vpop.f32.mrf.mxu1 }
 0x151   : > { %v392_v14 = vpop.f32.mrf.mxu0 }
 0x152   : > { %v2188_v4 = vpop.f32.mrf.mxu1 }
 0x153   : > { %v394_v18 = vpop.f32.mrf.mxu0 }
 0x154   : > { %v448_v19 = vpop.f32.mrf.mxu1 }
 0x155   : > { %v396_v20 = vpop.f32.mrf.mxu0 }
 0x156   : > { %v519_v21 = vpop.f32.mrf.mxu1 }
 0x157   : > { %v2656_v22 = vadd.f32 %v519_v21, %v392_v14  ;;  %v398_v23 = vpop.f32.mrf.mxu0 }
 0x158   : > { %v521_v24 = vpop.f32.mrf.mxu1 }
 0x159   : > { %v2658_v25 = vadd.f32 %v521_v24, %v394_v18  ;;  %v402_v26 = vpop.f32.mrf.mxu0 }
 0x15a   : > { %v523_v27 = vpop.f32.mrf.mxu1 }
 0x15b   : > { %v2660_v28 = vadd.f32 %v523_v27, %v396_v20  ;;  %v404_v29 = vpop.f32.mrf.mxu0 }
 0x15c   : > { %v525_v30 = vpop.f32.mrf.mxu1 }
 0x15d   : > { %v2662_v31 = vadd.f32 %v525_v30, %v398_v23  ;;  %v406_v32 = vpop.f32.mrf.mxu0 }
 0x15e   : > { %v529_v33 = vpop.f32.mrf.mxu1 }
 0x15f   : > { %v530_v34 = vadd.f32 %v529_v33, %v402_v26  ;;  %v408_v35 = vpop.f32.mrf.mxu0 }
 0x160   : > { %v531_v36 = vpop.f32.mrf.mxu1 }
 0x161   : > { %v532_v37 = vadd.f32 %v531_v36, %v404_v29  ;;  %v2193_v38 = vpop.f32.mrf.mxu0 }
 0x162   : > { %v581_v39 = vadd.f32 %v2193_v38, %v2187_v8  ;;  %v533_v40 = vpop.f32.mrf.mxu1 }
 0x163   : > { %v2664_v41 = vadd.f32 %v533_v40, %v406_v32  ;;  %v572_v42 = vpop.f32.mrf.mxu0 }
 0x164   : > { %v2666_v43 = vadd.f32 %v572_v42, %v445_v13  ;;  %v535_v44 = vpop.f32.mrf.mxu1 }
 0x165   : > { %v2668_v45 = vadd.f32 %v535_v44, %v408_v35  ;;  %v2194_v46 = vpop.f32.mrf.mxu0 }
 0x166   : > { %v584_v47 = vadd.f32 %v2194_v46, %v2188_v4  ;;  %v2199_v48 = vpop.f32.mrf.mxu1 }
 0x167   : > { %v2670_v49 = vadd.f32 %v2199_v48, %v581_v39  ;;  %v575_v50 = vpop.f32.mrf.mxu0 }
 0x168   : > { %v2672_v51 = vadd.f32 %v575_v50, %v448_v19  ;;  %v2674_v52 = vpop.f32.mrf.mxu1 }
 0x169   : > { %v678_v53 = vpop.f32.mrf.mxu0 }
 0x16a   : > { %v2200_v54 = vpop.f32.mrf.mxu1 }
 0x16b   : > { %v2676_v55 = vadd.f32 %v2200_v54, %v584_v47  ;;  %v680_v56 = vpop.f32.mrf.mxu0 }
 0x16c   : > { %v734_v57 = vpop.f32.mrf.mxu1 }
 0x16d   : > { %v682_v58 = vpop.f32.mrf.mxu0 }
 0x16e   : > { %v849_v59 = vpop.f32.mrf.mxu1 }
 0x16f   : > { %v684_v60 = vpop.f32.mrf.mxu0 }
 0x170   : > { %v851_v61 = vpop.f32.mrf.mxu1 }
 0x171   : > { %v688_v62 = vpop.f32.mrf.mxu0 }
 0x172   : > { %v2678_v63 = vadd.f32 %v688_v62, %v530_v34  ;;  %v853_v0 = vpop.f32.mrf.mxu1 }
 0x173   : > { %v690_v1 = vpop.f32.mrf.mxu0 }
 0x174   : > { %v753_v2 = vadd.f32 %v690_v1, %v532_v37  ;;  %v855_v3 = vpop.f32.mrf.mxu1 }
 0x175   : > { %v692_v5 = vpop.f32.mrf.mxu0 }
 0x176   : > { %v859_v6 = vpop.f32.mrf.mxu1 }
 0x177   : > { %v694_v7 = vpop.f32.mrf.mxu0 }
 0x178   : > { %v861_v9 = vpop.f32.mrf.mxu1 }
 0x179   : > { %v2205_v10 = vpop.f32.mrf.mxu0 }
 0x17a   : > { %v863_v11 = vpop.f32.mrf.mxu1 }
 0x17b   : > { %v902_v8 = vpop.f32.mrf.mxu0 }
 0x17c   : > { %v865_v12 = vpop.f32.mrf.mxu1 }
 0x17d   : > { %v2206_v13 = vpop.f32.mrf.mxu0 }
 0x17e   : > { %v2211_v14 = vpop.f32.mrf.mxu1 }
 0x17f   : > { %v905_v4 = vpop.f32.mrf.mxu0 }
 0x180   : > { %v1073_v18 = vpop.f32.mrf.mxu1 }
 0x181   : > { %v1020_v19 = vpop.f32.mrf.mxu0 }
 0x182   : > { %v2212_v20 = vpop.f32.mrf.mxu1 }
 0x183   : > { %v1022_v21 = vpop.f32.mrf.mxu0 }
 0x184   : > { %v1076_v23 = vpop.f32.mrf.mxu1 }
 0x185   : > { %v1024_v24 = vpop.f32.mrf.mxu0 }
 0x186   : > { %v1191_v26 = vpop.f32.mrf.mxu1 }
 0x187   : > { %v1026_v27 = vpop.f32.mrf.mxu0 }
 0x188   : > { %v1193_v29 = vpop.f32.mrf.mxu1 }
 0x189   : > { %v1030_v30 = vpop.f32.mrf.mxu0 }
 0x18a   : > { %v2680_v32 = vpop.f32.mrf.mxu1 }
 0x18b   : > { %v1032_v33 = vpop.f32.mrf.mxu0 }
 0x18c   : > { %v2682_v34 = vpop.f32.mrf.mxu1 }
 0x18d   : > { %v2684_v35 = vpop.f32.mrf.mxu0 }
 0x18e   : > { %v2686_v36 = vpop.f32.mrf.mxu1 }
 0x18f   : > { %v2688_v37 = vpop.f32.mrf.mxu0 }
 0x190   : > { %v2690_v38 = vpop.f32.mrf.mxu1 }
 0x191   : > { %v2217_v39 = vpop.f32.mrf.mxu0 }
 0x192   : > { %v2692_v40 = vpop.f32.mrf.mxu1 }
 0x193   : > { %v2694_v42 = vpop.f32.mrf.mxu0 }
 0x194   : > { %v2696_v44 = vpop.f32.mrf.mxu1 }
 0x195   : > { %2862 = vst [vmem:[#allocation5_spill] sm:$0xff] %v2696_v44  ;;  %v2698_v46 = vpop.f32.mrf.mxu0 }
 0x196   : > { %2863 = vst [vmem:[#allocation6_spill] sm:$0xff] %v2698_v46  ;;  %v2700_v47 = vpop.f32.mrf.mxu1 }
 0x197   : > { %2864 = vst [vmem:[#allocation7_spill] sm:$0xff] %v2700_v47  ;;  %v2702_v48 = vpop.f32.mrf.mxu0  ;;  %v746_v47 = vadd.f32 %v678_v53, %v2656_v22 }
 0x198   : > { %2865 = vst [vmem:[#allocation8_spill] sm:$0xff] %v2702_v48  ;;  %v2704_v50 = vpop.f32.mrf.mxu1  ;;  %v747_v48 = vadd.f32 %v680_v56, %v2658_v25  ;;  %v755_v25 = vadd.f32 %v692_v5, %v2664_v41  ;;  %v756_v56 = vadd.f32 %v694_v7, %v2668_v45 }
 0x199   : > { %2866 = vst [vmem:[#allocation9_spill] sm:$0xff] %v2704_v50  ;;  %v2706_v54 = vpop.f32.mrf.mxu0 }
 0x19a   : > { %2867 = vst [vmem:[#allocation10_spill] sm:$0xff] %v2706_v54  ;;  %v2708_v62 = vpop.f32.mrf.mxu1  ;;  %v749_v54 = vadd.f32 %v682_v58, %v2660_v28  ;;  %v924_v58 = vadd.f32 %v861_v9, %v753_v2 }
 0x19b   : > { %2868 = vst [vmem:[#allocation11_spill] sm:$0xff] %v2708_v62  ;;  %v2710_v1 = vpop.f32.mrf.mxu0  ;;  %v750_v62 = vadd.f32 %v684_v60, %v2662_v31  ;;  %v923_v31 = vadd.f32 %v859_v6, %v2678_v63  ;;  %v925_v60 = vadd.f32 %v2205_v10, %v2670_v49 }
 0x19c   : > { %2869 = vst [vmem:[#allocation12_spill] sm:$0xff] %v2710_v1  ;;  %v2712_v16 = vpop.f32.mrf.mxu1  ;;  %v918_v1 = vadd.f32 %v851_v61, %v747_v48  ;;  %v920_v22 = vadd.f32 %v853_v0, %v749_v54  ;;  %v1095_v9 = vadd.f32 %v1032_v33, %v924_v58 }
 0x19d   : > { %2870 = vst [vmem:[#allocation13_spill] sm:$0xff] %v2712_v16  ;;  %v2714_v15 = vpop.f32.mrf.mxu0  ;;  %v748_v16 = vadd.f32 %v2674_v52, %v2666_v43  ;;  %v921_v53 = vadd.f32 %v855_v3, %v750_v62  ;;  %v926_v52 = vadd.f32 %v863_v11, %v755_v25  ;;  %v1096_v0 = vadd.f32 %v2211_v14, %v925_v60  ;;  %v2738_v11 = vpop.permute.xlu1 %1796 }
 0x19e   : > { %2871 = vst [vmem:[#allocation14_spill] sm:$0xff] %v2714_v15  ;;  %v2716_v17 = vpop.f32.mrf.mxu1  ;;  %v751_v15 = vadd.f32 %v734_v57, %v2672_v51  ;;  %v927_v51 = vadd.f32 %v865_v12, %v756_v56  ;;  %v928_v57 = vadd.f32 %v2206_v13, %v2676_v55  ;;  %v1089_v41 = vadd.f32 %v1022_v21, %v918_v1  ;;  %v2875_v21 = vld [vmem:[#allocation6_spill] sm:$0xff] }
 0x19f   : > { %2872 = vst [vmem:[#allocation15_spill] sm:$0xff] %v2716_v17  ;;  %v2718_v44 = vpop.f32.mrf.mxu0  ;;  %v917_v17 = vadd.f32 %v849_v59, %v746_v47  ;;  %v1091_v48 = vadd.f32 %v1024_v24, %v920_v22  ;;  %v1092_v63 = vadd.f32 %v1026_v27, %v921_v53  ;;  %v2876_v24 = vld [vmem:[#allocation7_spill] sm:$0xff]  ;;  %v2877_v27 = vld [vmem:[#allocation8_spill] sm:$0xff] }
 0x1a0   : > { %2873 = vst [vmem:[#allocation16_spill] sm:$0xff] %v2718_v44  ;;  %v2722_v46 = vpop.f32.mrf.mxu1  ;;  %v922_v59 = vadd.f32 %v905_v4, %v751_v15  ;;  %v1099_v45 = vadd.f32 %v2212_v20, %v928_v57  ;;  %v1260_v49 = vadd.f32 %v1193_v29, %v1089_v41  ;;  %v1098_v14 = vadd.f32 %v2688_v37, %v927_v51 }
 0x1a1   : > { %v2726_v50 = vpop.f32.mrf.mxu0  ;;  %v1088_v47 = vadd.f32 %v1020_v19, %v917_v17  ;;  %v1262_v15 = vadd.f32 %v2680_v32, %v1091_v48  ;;  %v1263_v55 = vadd.f32 %v2682_v34, %v1092_v63  ;;  %v1097_v17 = vadd.f32 %v2684_v35, %v926_v52  ;;  %v2878_v32 = vld [vmem:[#allocation5_spill] sm:$0xff] }
 0x1a2   : > { %2874 = vst [vmem:[#allocation17_spill] sm:$0xff] %v2726_v50  ;;  %v2731_v44 = vpop.f32.mrf.mxu1  ;;  %v919_v50 = vadd.f32 %v902_v8, %v748_v16  ;;  %v1093_v7 = vadd.f32 %v1076_v23, %v922_v59  ;;  %v1094_v16 = vadd.f32 %v1030_v30, %v923_v31  ;;  %v1267_v8 = vadd.f32 %v2217_v39, %v1096_v0  ;;  %v2879_v34 = vld [vmem:[#allocation9_spill] sm:$0xff]  ;;  %v2882_v54 = vld [vmem:[#allocation11_spill] sm:$0xff] }
 0x1a3   : > { %v1374_v28 = vpop.f32.mrf.mxu0  ;;  %v1259_v6 = vadd.f32 %v1191_v26, %v1088_v47  ;;  %v1266_v4 = vadd.f32 %v2690_v38, %v1095_v9  ;;  %v1268_v20 = vadd.f32 %v2692_v40, %v1097_v17  ;;  %v1270_v23 = vadd.f32 %v2875_v21, %v1099_v45  ;;  %v2881_v39 = vld [vmem:[#allocation12_spill] sm:$0xff] }
 0x1a4   : > { %v1539_v43 = vpop.f32.mrf.mxu1  ;;  %v1090_v3 = vadd.f32 %v1073_v18, %v919_v50  ;;  %v1265_v13 = vadd.f32 %v2686_v36, %v1094_v16  ;;  %v1438_v26 = vadd.f32 %v2876_v24, %v1267_v8  ;;  %v1264_v29 = vadd.f32 %v2877_v27, %v1093_v7  ;;  %v2880_v36 = vld [vmem:[#allocation10_spill] sm:$0xff]  ;;  %v2883_v62 = vld [vmem:[#allocation13_spill] sm:$0xff] }
 0x1a5   : > { %v1376_v61 = vpop.f32.mrf.mxu0  ;;  %v1269_v33 = vadd.f32 %v2878_v32, %v1098_v14  ;;  %v1430_v37 = vadd.f32 %v2880_v36, %v1259_v6  ;;  %v1431_v38 = vadd.f32 %v2881_v39, %v1260_v49  ;;  %v1441_v40 = vadd.f32 %v2882_v54, %v1270_v23  ;;  %v2884_v22 = vld [vmem:[#allocation14_spill] sm:$0xff]  ;;  %v2890_v36 = vld [vmem:[#allocation3_spill] sm:$0xff] }
 0x1a6   : > { %v1543_v5 = vpop.f32.mrf.mxu1  ;;  %v1261_v18 = vadd.f32 %v2694_v42, %v1090_v3  ;;  %v1792_v42 = vpop.permute.xlu0 %1791  ;;  %v1435_v1 = vadd.f32 %v2883_v62, %v1264_v29  ;;  %v1433_v53 = vadd.f32 %v2884_v22, %v1262_v15  ;;  %v2885_v31 = vld [vmem:[#allocation15_spill] sm:$0xff]  ;;  %v1437_v41 = vadd.f32 %v1374_v28, %v1266_v4  ;;  %v2889_v24 = vld [vmem:[#allocation2_spill] sm:$0xff] }
 0x1a7   : > { %v1378_v2 = vpop.f32.mrf.mxu0  ;;  %v1601_v58 = vadd.f32 %v2885_v31, %v1430_v37  ;;  %v2886_v60 = vld [vmem:[#allocation16_spill] sm:$0xff]  ;;  %v1602_v51 = vadd.f32 %v2722_v46, %v1431_v38  ;;  %v2762_v3 = vpop.permute.xlu1 %1801  ;;  %v1439_v6 = vadd.f32 %v1376_v61, %v1268_v20 }
 0x1a8   : > { %v1545_v10 = vpop.f32.mrf.mxu1  ;;  %v1432_v35 = vadd.f32 %v2879_v34, %v1261_v18  ;;  %v1434_v52 = vadd.f32 %v2886_v60, %v1263_v55  ;;  %v1604_v47 = vadd.f32 %v2731_v44, %v1433_v53  ;;  %v1440_v16 = vadd.f32 %v1378_v2, %v1269_v33  ;;  %v2888_v55 = vld [vmem:[#allocation4_spill] sm:$0xff] }
 0x1a9   : > { %v2229_v12 = vpop.f32.mrf.mxu0  ;;  %v2887_v57 = vld [vmem:[#allocation17_spill] sm:$0xff] }
 0x1aa   : > { %v1547_v19 = vpop.f32.mrf.mxu1  ;;  %v1609_v25 = vadd.f32 %v2229_v12, %v1438_v26  ;;  %v1436_v59 = vadd.f32 %v2887_v57, %v1265_v13  ;;  %v1605_v63 = vadd.f32 %v1539_v43, %v1434_v52  ;;  %v1608_v13 = vadd.f32 %v1545_v10, %v1437_v41  ;;  %v2769_v4 = vpop.permute.xlu0 %1806 }
 0x1ab   : > { %v1586_v30 = vpop.f32.mrf.mxu0  ;;  %v1610_v14 = vadd.f32 %v1547_v19, %v1439_v6 }
 0x1ac   : > { %v1549_v50 = vpop.f32.mrf.mxu1  ;;  %v1603_v45 = vadd.f32 %v1586_v30, %v1432_v35  ;;  %v1607_v49 = vadd.f32 %v1543_v5, %v1436_v59 }
 0x1ad   : > { %v2230_v56 = vpop.f32.mrf.mxu0  ;;  %v2767_v18 = vadd.f32 %v1549_v50, %v1440_v16 }
 0x1ae   : > { %v2235_v0 = vpop.f32.mrf.mxu1  ;;  %v1612_v15 = vadd.f32 %v2230_v56, %v1441_v40 }
 0x1af   : > { %v1780_v7 = vadd.f32 %v2235_v0, %v1609_v25  ;;  %v1589_v48 = vpop.f32.mrf.mxu0 }
 0x1b0   : > { %v1757_v9 = vpop.f32.mrf.mxu1  ;;  %v1606_v43 = vadd.f32 %v1589_v48, %v1435_v1 }
 0x1b1   : > { %v1849_v17 = vmul.f32 %v2888_v55, %v1780_v7  ;;  %v1774_v46 = vadd.f32 %v1757_v9, %v1603_v45  ;;  %v1817_v8 = vsub.f32 %v1780_v7, %v2762_v3  ;;  %v1704_v12 = vpop.f32.mrf.mxu0 }
 0x1b2   : > { %v1772_v44 = vadd.f32 %v1704_v12, %v1601_v58  ;;  %v2236_v28 = vpop.f32.mrf.mxu1 }
 0x1b3   : > { %v1811_v61 = vsub.f32 %v1774_v46, %v1792_v42  ;;  %v1843_v5 = vmul.f32 %v2888_v55, %v1774_v46  ;;  %v1783_v2 = vadd.f32 %v2236_v28, %v1612_v15  ;;  %v1706_v20 = vpop.f32.mrf.mxu0  ;;  %v2772_v21 = vmul.f32 %v1817_v8, %v1817_v8 }
 0x1b4   : > { %v1809_v23 = vsub.f32 %v1772_v44, %v1792_v42  ;;  %v1841_v26 = vmul.f32 %v2889_v24, %v1772_v44  ;;  %v1773_v27 = vadd.f32 %v1706_v20, %v1602_v51  ;;  %v1760_v10 = vpop.f32.mrf.mxu1  ;;  %v1865_v62 = vsel %vm1854_vm11, %v1849_v17, 0.0 }
 0x1b5   : > { %v1889_v19 = vmul.f32 %v1811_v61, %v1811_v61  ;;  %v2776_v29 = vmul.f32 %v2888_v55, %v1783_v2  ;;  %v1820_v30 = vsub.f32 %v1783_v2, %v2769_v4  ;;  %v1777_v32 = vadd.f32 %v1760_v10, %v1606_v43  ;;  %v1708_v33 = vpop.f32.mrf.mxu0 }
 0x1b6   : > { %v1887_v34 = vmul.f32 %v1809_v23, %v1809_v23  ;;  %v1810_v35 = vsub.f32 %v1773_v27, %v1792_v42  ;;  %v1842_v37 = vmul.f32 %v2890_v36, %v1773_v27  ;;  %v1775_v39 = vadd.f32 %v1708_v33, %v1604_v47 }
 0x1b7   : > { %v1898_v38 = vmul.f32 %v1820_v30, %v1820_v30  ;;  %v1814_v50 = vsub.f32 %v1777_v32, %v2738_v11  ;;  %v1846_v54 = vmul.f32 %v2888_v55, %v1777_v32  ;;  %v1710_v40 = vpop.f32.mrf.mxu0  ;;  %v1855_v60 = vsel %vm1854_vm11, %v1843_v5, 0.0 }
 0x1b8   : > { %v1899_v1 = vmul.f32 %v1887_v34, %v2889_v24  ;;  %v1888_v22 = vmul.f32 %v1810_v35, %v1810_v35  ;;  %v1812_v53 = vsub.f32 %v1775_v39, %v2738_v11  ;;  %v1844_v25 = vmul.f32 %v2889_v24, %v1775_v39 }
 0x1b9   : > { %v1892_v56 = vmul.f32 %v1814_v50, %v1814_v50  ;;  %v1776_v42 = vadd.f32 %v1710_v40, %v1605_v63  ;;  %v1714_v31 = vpop.f32.mrf.mxu0  ;;  %v1853_v58 = vadd.f32 %v1842_v37, %v1841_v26  ;;  %v1901_v59 = vmul.f32 %v1889_v19, %v2888_v55 }
 0x1ba   : > { %v1900_v52 = vmul.f32 %v1888_v22, %v2890_v36  ;;  %v1890_v51 = vmul.f32 %v1812_v53, %v1812_v53  ;;  %v1778_v57 = vadd.f32 %v1714_v31, %v1607_v49  ;;  %v1860_v17 = vsel %vm1854_vm11, %v1846_v54, 0.0  ;;  %v1821_v53 = vld [vmem:[%s2633_s22] sm:$0xff]  ;;  %v1884_v31 = vld [vmem:[%s2638_s25 + $0x8] sm:$0xff] }
 0x1bb   : > { %v1813_v0 = vsub.f32 %v1776_v42, %v2738_v11  ;;  %v1845_v47 = vmul.f32 %v2890_v36, %v1776_v42  ;;  %v1716_v41 = vpop.f32.mrf.mxu0  ;;  %v1856_v45 = vadd.f32 %v1855_v60, %v1853_v58  ;;  %v1904_v7 = vmul.f32 %v1892_v56, %v2888_v55  ;;  %v1883_v58 = vld [vmem:[%s2638_s25] sm:$0xff] }
 0x1bc   : > { %v1902_v48 = vmul.f32 %v1890_v51, %v2889_v24  ;;  %v1815_v63 = vsub.f32 %v1778_v57, %v2762_v3  ;;  %v1847_v6 = vmul.f32 %v2889_v24, %v1778_v57  ;;  %v1779_v16 = vadd.f32 %v1716_v41, %v1608_v13 }
 0x1bd   : > { %v1891_v9 = vmul.f32 %v1813_v0, %v1813_v0  ;;  %1857 = vadd.xlane.f32.xlu1 %v1856_v45  ;;  %v1718_v49 = vpop.f32.mrf.mxu0  ;;  %v1859_v15 = vadd.f32 %v1845_v47, %v1844_v25  ;;  %v1911_v11 = vadd.f32 %v1900_v52, %v1899_v1  ;;  %v1917_v5 = vsel %vm1854_vm11, %v1904_v7, 0.0  ;;  %v1823_v0 = vld [vmem:[%s2633_s22 + $0x10] sm:$0xff] }
 0x1be   : > { %v1893_v46 = vmul.f32 %v1815_v63, %v1815_v63  ;;  %v1816_v8 = vsub.f32 %v1779_v16, %v2762_v3  ;;  %v1848_v12 = vmul.f32 %v2890_v36, %v1779_v16  ;;  %v1781_v44 = vadd.f32 %v1718_v49, %v1610_v14  ;;  %v1885_v63 = vld [vmem:[%s2638_s25 + $0x10] sm:$0xff] }
 0x1bf   : > { %v1903_v28 = vmul.f32 %v1891_v9, %v2890_v36  ;;  %v1720_v43 = vpop.f32.mrf.mxu0  ;;  %v1861_v61 = vadd.f32 %v1860_v17, %v1859_v15  ;;  %v1912_v13 = vsel %vm1854_vm11, %v1901_v59, 0.0  ;;  %v1910_v32 = vmul.f32 %v1898_v38, %v2888_v55  ;;  %v1824_v59 = vld [vmem:[%s2633_s22 + $0x18] sm:$0xff] }
 0x1c0   : > { %v1905_v2 = vmul.f32 %v1893_v46, %v2889_v24  ;;  %v1894_v20 = vmul.f32 %v1816_v8, %v1816_v8  ;;  %v1818_v23 = vsub.f32 %v1781_v44, %v2769_v4  ;;  %v1850_v26 = vmul.f32 %v2889_v24, %v1781_v44 }
 0x1c1   : > { %v1782_v3 = vadd.f32 %v1720_v43, %v2767_v18  ;;  %1862 = vadd.xlane.f32.xlu0 %v1861_v61  ;;  %v1916_v27 = vadd.f32 %v1903_v28, %v1902_v48  ;;  %v1913_v14 = vadd.f32 %v1912_v13, %v1911_v11  ;;  %v1864_v10 = vadd.f32 %v1848_v12, %v1847_v6  ;;  %v1886_v48 = vld [vmem:[%s2638_s25 + $0x18] sm:$0xff] }
 0x1c2   : > { %v1906_v19 = vmul.f32 %v1894_v20, %v2890_v36  ;;  %v1896_v30 = vmul.f32 %v1818_v23, %v1818_v23  ;;  %v1907_v33 = vmul.f32 %v2772_v21, %v2888_v55  ;;  %v1870_v55 = vsel %vm1854_vm11, %v2776_v29, 0.0 }
 0x1c3   : > { %v1819_v34 = vsub.f32 %v1782_v3, %v2769_v4  ;;  %v1851_v35 = vmul.f32 %v2890_v36, %v1782_v3  ;;  %v1918_v37 = vadd.f32 %v1917_v5, %v1916_v27  ;;  %v1866_v39 = vadd.f32 %v1865_v62, %v1864_v10 }
 0x1c4   : > { %v1908_v18 = vmul.f32 %v1896_v30, %v2889_v24  ;;  %v1921_v50 = vadd.f32 %v1906_v19, %v1905_v2  ;;  %v1922_v38 = vsel %vm1854_vm11, %v1907_v33, 0.0  ;;  %v1927_v1 = vsel %vm1854_vm11, %v1910_v32, 0.0 }
 0x1c5   : > { %v1897_v54 = vmul.f32 %v1819_v34, %v1819_v34  ;;  %1919 = vadd.xlane.f32.xlu1 %v1918_v37  ;;  %1914 = vadd.xlane.f32.xlu0 %v1913_v14  ;;  %v1869_v40 = vadd.f32 %v1851_v35, %v1850_v26 }
 0x1c6   : > { %v1923_v4 = vadd.f32 %v1922_v38, %v1921_v50 }
 0x1c7   : > { %v1909_v21 = vmul.f32 %v1897_v54, %v2890_v36  ;;  %v1871_v62 = vadd.f32 %v1870_v55, %v1869_v40  ;;  %v1822_v36 = vld [vmem:[%s2633_s22 + $0x8] sm:$0xff] }
 0x1c9   : > { %1872 = vadd.xlane.f32.xlu1 %v1871_v62  ;;  %1867 = vadd.xlane.f32.xlu0 %v1866_v39  ;;  %v1926_v24 = vadd.f32 %v1909_v21, %v1908_v18 }
 0x1cb   : > { %v1928_v22 = vadd.f32 %v1927_v1, %v1926_v24 }
 0x1cd   : > { %1929 = vadd.xlane.f32.xlu1 %v1928_v22  ;;  %1924 = vadd.xlane.f32.xlu0 %v1923_v4 }
 0x246   : > { %v1858_v29 = vpop.xlane.xlu1 %1857 }
 0x247   : > { %v1874_v25 = vadd.f32 %v1858_v29, %v1821_v53 }
 0x249   : > { %1879 = vst.msk [vmem:[%s2633_s22] sm:$0xff] %vm286_vm10, %v1874_v25 }
 0x24a   : > { %v1863_v56 = vpop.xlane.xlu0 %1862 }
 0x24b   : > { %v1875_v42 = vadd.f32 %v1863_v56, %v1822_v36 }
 0x24d   : > { %1880 = vst.msk [vmem:[%s2633_s22 + $0x8] sm:$0xff] %vm286_vm10, %v1875_v42 }
 0x24e   : > { %v1920_v60 = vpop.xlane.xlu1 %1919  ;;  %v1915_v52 = vpop.xlane.xlu0 %1914 }
 0x24f   : > { %v1932_v51 = vadd.f32 %v1920_v60, %v1884_v31  ;;  %v1931_v57 = vadd.f32 %v1915_v52, %v1883_v58 }
 0x251   : > { %1936 = vst.msk [vmem:[%s2638_s25 + $0x8] sm:$0xff] %vm286_vm10, %v1932_v51  ;;  %1935 = vst.msk [vmem:[%s2638_s25] sm:$0xff] %vm286_vm10, %v1931_v57 }
 0x252   : > { %v1873_v47 = vpop.xlane.xlu1 %1872  ;;  %v1868_v41 = vpop.xlane.xlu0 %1867 }
 0x253   : > { %v1877_v45 = vadd.f32 %v1873_v47, %v1824_v59  ;;  %v1876_v7 = vadd.f32 %v1868_v41, %v1823_v0 }
 0x255   : > { %1882 = vst.msk [vmem:[%s2633_s22 + $0x18] sm:$0xff] %vm286_vm10, %v1877_v45  ;;  %1881 = vst.msk [vmem:[%s2633_s22 + $0x10] sm:$0xff] %vm286_vm10, %v1876_v7 }
 0x256   : > { %v1930_v6 = vpop.xlane.xlu1 %1929  ;;  %v1925_v16 = vpop.xlane.xlu0 %1924 }
 0x257   : > { %v1934_v9 = vadd.f32 %v1930_v6, %v1886_v48  ;;  %v1933_v49 = vadd.f32 %v1925_v16, %v1885_v63 }
 0x259   : > { %1938 = vst.msk [vmem:[%s2638_s25 + $0x18] sm:$0xff] %vm286_vm10, %v1934_v9  ;;  %1937 = vst.msk [vmem:[%s2638_s25 + $0x10] sm:$0xff] %vm286_vm10, %v1933_v49 }
 0x25a PF: > { %s16_s20 = sadd.s32 1, %s2333_s20   ;;  %s2891_s18 = smov %s2329_s19 }
 0x25b   : > { %p13_p5 = scmp.ge.s32.totalorder %s16_s20, 4   ;;  %s2892_s19 = smov %s2894_s21 }
 0x25d   :  { %15 = sbr.rel (!%p13_p5) target bundleno = 2 (0x2), region = 93 }

</bundles_post_ra>
